<compile_context>
chip_gen: v7x
topology: tpu7x:2x2x1
jax: 0.10.0
libtpu: 0.0.40
codegen_flags: <defaults>
</compile_context>

<pallas_src>
import functools
import math

import jax
import jax.numpy as jnp
from jax import lax
from jax.experimental import pallas as pl
from jax.experimental.pallas import tpu as pltpu


def _sdpa_kernel(q_ref, k_ref, v_ref, o_ref, a_ref=None, *,
                 inv_temp, approx_recip, mxu_bf16):
    # q_ref: (hblk, tq, D), k_ref: (hblk, Lk, D), v_ref: (hblk, Lk, Dv)
    # Fold 1/temperature into the small (hblk, tq, D) q tile: O(tq*D) VALU work
    # instead of O(tq*Lk) on the f32 score tile.
    q = q_ref[...] * inv_temp
    k = k_ref[...]
    v = v_ref[...]
    if mxu_bf16 and q.dtype == jnp.float32:
        # Flag-gated bf16 MXU fast path for f32 inputs (f32 accumulation kept).
        q = q.astype(jnp.bfloat16)
        k = k.astype(jnp.bfloat16)
        v = v.astype(jnp.bfloat16)

    # Batched QK^T on the MXU: contract over D directly (no k.T / XLU
    # transpose), native input dtype, f32 accumulation.
    s = lax.dot_general(
        q, k,
        dimension_numbers=(((2,), (2,)), ((0,), (0,))),
        preferred_element_type=jnp.float32,
    )  # (hblk, tq, Lk), f32

    # Numerically stable softmax over the key axis, in f32.
    s = s - jnp.max(s, axis=-1, keepdims=True)
    p = jnp.exp(s)
    denom = jnp.sum(p, axis=-1, keepdims=True)
    inv_denom = pl.reciprocal(denom, approx=approx_recip)  # EUP slot when approx

    if a_ref is not None:
        # attn must be returned normalized; pay the (tq, Lk) multiply once and
        # reuse the normalized tile for the PV matmul.
        p = p * inv_denom
        a_ref[...] = p.astype(a_ref.dtype)
        o = lax.dot_general(
            p.astype(v.dtype), v,
            dimension_numbers=(((2,), (1,)), ((0,), (0,))),
            preferred_element_type=jnp.float32,
        )  # (hblk, tq, Dv)
    else:
        # Flash-style path: matmul the un-normalized exp scores and rescale the
        # much smaller (tq, Dv) result instead of the (tq, Lk) tile.
        o = lax.dot_general(
            p.astype(v.dtype), v,
            dimension_numbers=(((2,), (1,)), ((0,), (0,))),
            preferred_element_type=jnp.float32,
        )
        o = o * inv_denom
    o_ref[...] = o.astype(o_ref.dtype)


def _divisors_desc(n):
    return [d for d in range(n, 0, -1) if n % d == 0]


def _sublane_align(dtype):
    # 8 rows for f32, 16 for bf16/f16, 32 for int8/fp8 (sublane packing).
    return 8 * max(1, 4 // jnp.dtype(dtype).itemsize)


def _pick_q_tile(lq, dtype, cap=256):
    """Largest Lq tile <= cap that evenly divides Lq; dtype-aware alignment,
    preferring MXU-friendly 256/128 multiples."""
    if lq <= cap:
        return lq
    divs = [d for d in range(cap, 0, -1) if lq % d == 0]
    for want in (256, 128, _sublane_align(dtype)):
        for d in divs:
            if d % want == 0:
                return d
    return lq  # full-extent block is always legal


def _shrink_q_tile(tq, lq, dtype):
    align = _sublane_align(dtype)
    for d in range(tq - 1, align - 1, -1):
        if lq % d == 0 and d % align == 0:
            return d
    return None


def _tpu_vmem_profile():
    """Per-generation (head-block budget, scoped-VMEM cap, K/V buffer depth)."""
    try:
        info = pltpu.get_tpu_info()
        cap = int(getattr(info, "vmem_capacity_bytes", 0) or 0)
    except Exception:
        cap = 0
    if cap >= 100 * 1024 * 1024:
        # 128 MiB parts (v5e / v6e): big head blocks + deeper K/V buffering.
        return 56 * 1024 * 1024, 96 * 1024 * 1024, 3
    # 64 MiB-per-TC parts (v7x) or unknown: conservative.
    return 26 * 1024 * 1024, 50 * 1024 * 1024, 2


def _step_vmem_bytes(hblk, tq, lk, d, dv, in_itemsize, out_itemsize,
                     attn_itemsize, pv_itemsize, emit_attn, kv_buffers):
    """Per-grid-step working-set estimate (pipelined buffers + live tiles)."""
    q_io = 2 * hblk * tq * d * in_itemsize
    kv_io = kv_buffers * hblk * lk * (d + dv) * in_itemsize
    o_io = 2 * hblk * tq * dv * out_itemsize
    a_io = (2 * hblk * tq * lk * attn_itemsize) if emit_attn else 0
    # f32 scores + f32 exp tile + low-precision copy for PV matmul + f32 out.
    inter = hblk * tq * lk * (4 + 4 + pv_itemsize) + hblk * tq * dv * 4
    return q_io + kv_io + o_io + a_io + inter


def _pick_hblk(bh, fits):
    fitting = [d for d in _divisors_desc(bh) if fits(d)]
    if not fitting:
        return 1
    best = fitting[0]
    # Prefer an even number of head steps (balanced v7x megacore shards, no
    # duplicated K/V DMA across cores) as long as it costs at most 2x in hblk.
    for d in fitting:
        if (bh // d) % 2 == 0 and 2 * d >= best:
            return d
    return best


def _kv_block_spec(shape, index_map, buffers):
    if buffers > 2 and hasattr(pl, "Buffered"):
        try:
            return pl.BlockSpec(shape, index_map, pipeline_mode=pl.Buffered(buffers))
        except TypeError:
            pass
    return pl.BlockSpec(shape, index_map)


def scaled_dot_product_attention(q, k, v, temperature, *, return_attn=True,
                                 attn_dtype=None, approx_reciprocal=None,
                                 mxu_bf16=False):
    """q: (B,H,Lq,D), k: (B,H,Lk,D), v: (B,H,Lk,Dv) -> (out, attn).

    Eval-mode, mask=None, graph_pos=None path of the PyTorch module.
    attn_dtype: dtype of the returned attention matrix. Defaults to the input
      dtype when it is <= 16 bits, otherwise bfloat16 (halves the dominant HBM
      writeback stream; `out` keeps the input dtype with f32 accumulation).
    """
    B, H, Lq, D = q.shape
    Bk, Hk, Lk, Dk = k.shape
    Bv, Hv, Lkv, Dv = v.shape
    assert (B, H, D) == (Bk, Hk, Dk) and (B, H, Lk) == (Bv, Hv, Lkv)

    if approx_reciprocal is None:
        # Exact reciprocal for f32 inputs; approx (free EUP slot) otherwise.
        approx_reciprocal = bool(q.dtype != jnp.float32)
    if attn_dtype is None:
        attn_dtype = q.dtype if jnp.dtype(q.dtype).itemsize <= 2 else jnp.bfloat16
    attn_dtype = jnp.dtype(attn_dtype)

    inv_temp = 1.0 / float(temperature)
    out_dtype = q.dtype

    BH = B * H
    q3 = q.reshape(BH, Lq, D)
    k3 = k.reshape(BH, Lk, D)
    v3 = v.reshape(BH, Lk, Dv)

    in_itemsize = jnp.dtype(q.dtype).itemsize
    out_itemsize = jnp.dtype(out_dtype).itemsize
    pv_itemsize = 2 if (mxu_bf16 or in_itemsize <= 2) else 4

    budget, limit_cap, kv_buffers = _tpu_vmem_profile()

    def step_bytes(h, t, bufs):
        return _step_vmem_bytes(h, t, Lk, D, Dv, in_itemsize, out_itemsize,
                                attn_dtype.itemsize, pv_itemsize,
                                return_attn, bufs)

    # q tile: shrink until a single head fits the per-generation budget.
    tq = _pick_q_tile(Lq, q.dtype)
    while step_bytes(1, tq, kv_buffers) > budget:
        smaller = _shrink_q_tile(tq, Lq, q.dtype)
        if smaller is None:
            break  # TODO(synk): Lk-tiled online softmax needed for this regime.
        tq = smaller

    hblk = _pick_hblk(BH, lambda d: step_bytes(d, tq, kv_buffers) <= budget)
    q_tiles = Lq // tq
    g_steps = BH // hblk
    grid = (g_steps, q_tiles)

    # Shard megacore along the head axis (K/V fetched once per core); only let
    # the q-tile axis shard when there is a single head step.
    dims = ("parallel", "arbitrary") if g_steps >= 2 else ("parallel", "parallel")

    # Always set the scoped-VMEM limit explicitly (v5e default is only 16 MiB),
    # with headroom for compiler-internal scratch, capped below physical VMEM.
    need = step_bytes(hblk, tq, kv_buffers)
    vmem_limit = int(min(limit_cap, max(int(need * 1.3), 32 * 1024 * 1024)))

    kernel = functools.partial(_sdpa_kernel, inv_temp=inv_temp,
                               approx_recip=approx_reciprocal, mxu_bf16=mxu_bf16)

    out_shapes = [jax.ShapeDtypeStruct((BH, Lq, Dv), out_dtype)]
    if return_attn:
        out_shapes.append(jax.ShapeDtypeStruct((BH, Lq, Lk), attn_dtype))

    def build_call(bufs):
        in_specs = [
            pl.BlockSpec((hblk, tq, D), lambda g, i: (g, i, 0)),
            _kv_block_spec((hblk, Lk, D), lambda g, i: (g, 0, 0), bufs),
            _kv_block_spec((hblk, Lk, Dv), lambda g, i: (g, 0, 0), bufs),
        ]
        # TODO(synk): if profiling shows vst-slot saturation for Dv < 128, emit
        # a lane-dense (tq, hblk*Dv) output slab and reshape in the wrapper.
        out_specs = [pl.BlockSpec((hblk, tq, Dv), lambda g, i: (g, i, 0))]
        if return_attn:
            out_specs.append(pl.BlockSpec((hblk, tq, Lk), lambda g, i: (g, i, 0)))
        grid_spec = pltpu.PrefetchScalarGridSpec(
            num_scalar_prefetch=0, grid=grid,
            in_specs=in_specs, out_specs=out_specs)
        return pl.pallas_call(
            kernel,
            out_shape=tuple(out_shapes),
            grid_spec=grid_spec,
            compiler_params=pltpu.CompilerParams(
                dimension_semantics=dims,
                vmem_limit_bytes=vmem_limit,
            ),
        )

    try:
        results = build_call(kv_buffers)(q3, k3, v3)
    except Exception:
        if kv_buffers <= 2:
            raise
        results = build_call(2)(q3, k3, v3)  # fall back to default buffering

    out = results[0].reshape(B, H, Lq, Dv)
    if not return_attn:
        return out, None
    attn = results[1].reshape(B, H, Lq, Lk)
    return out, attn


def _reference(q, k, v, temperature):
    s = jnp.einsum("bhqd,bhkd->bhqk", q / temperature, k)
    p = jax.nn.softmax(s, axis=-1)
    return jnp.einsum("bhqk,bhkd->bhqd", p, v), p


if __name__ == "__main__":
    B, H, Lq, Lk, D = 2, 4, 8, 8, 32
    temperature = math.sqrt(D)

    key = jax.random.PRNGKey(0)
    kq, kk, kv = jax.random.split(key, 3)
    q = jax.random.normal(kq, (B, H, Lq, D), dtype=jnp.float32)
    k = jax.random.normal(kk, (B, H, Lk, D), dtype=jnp.float32)
    v = jax.random.normal(kv, (B, H, Lk, D), dtype=jnp.float32)

    ref_out, ref_attn = _reference(q, k, v, temperature)

    # 1) f32 path, full-precision attn output (exact reciprocal, f32 MXU).
    out, attn = scaled_dot_product_attention(q, k, v, temperature,
                                             attn_dtype=jnp.float32)
    out, attn = jax.block_until_ready((out, attn))
    assert out.shape == (B, H, Lq, D) and attn.shape == (B, H, Lq, Lk)
    assert jnp.allclose(out, ref_out, atol=2e-5, rtol=2e-5)
    assert jnp.allclose(attn, ref_attn, atol=2e-5, rtol=2e-5)

    # 2) Default knobs: f32 out, bf16 attn writeback.
    out_d, attn_d = scaled_dot_product_attention(q, k, v, temperature)
    out_d, attn_d = jax.block_until_ready((out_d, attn_d))
    assert attn_d.dtype == jnp.bfloat16
    assert jnp.allclose(out_d, ref_out, atol=2e-5, rtol=2e-5)
    assert jnp.allclose(attn_d.astype(jnp.float32), ref_attn, atol=2e-2, rtol=2e-2)

    # 3) Flash-style path (no attn writeback, deferred softmax normalization).
    out_f, attn_f = scaled_dot_product_attention(q, k, v, temperature,
                                                 return_attn=False)
    out_f = jax.block_until_ready(out_f)
    assert attn_f is None
    assert jnp.allclose(out_f, ref_out, atol=2e-5, rtol=2e-5)

    # 4) bf16 inputs (bf16 MXU matmuls, f32 accumulation, approx reciprocal).
    qb, kb, vb = (x.astype(jnp.bfloat16) for x in (q, k, v))
    out_b, attn_b = scaled_dot_product_attention(qb, kb, vb, temperature)
    out_b, attn_b = jax.block_until_ready((out_b, attn_b))
    assert jnp.allclose(out_b.astype(jnp.float32), ref_out, atol=3e-2, rtol=3e-2)
    assert jnp.allclose(attn_b.astype(jnp.float32), ref_attn, atol=3e-2, rtol=3e-2)

    # 5) f32 inputs with the flag-gated bf16 MXU fast path.
    out_m, _ = scaled_dot_product_attention(q, k, v, temperature,
                                            return_attn=False, mxu_bf16=True)
    out_m = jax.block_until_ready(out_m)
    assert jnp.allclose(out_m, ref_out, atol=3e-2, rtol=3e-2)

    print("KERNEL_OK")
</pallas_src>

<mosaic_0001>
module attributes {stable_mosaic.version = 11 : i64} {
  func.func @_sdpa_kernel(%arg0: i32, %arg1: i32, %arg2: memref<4x8x32xf32, #tpu.memory_space<vmem>>, %arg3: memref<4x8x32xf32, #tpu.memory_space<vmem>>, %arg4: memref<4x8x32xf32, #tpu.memory_space<vmem>>, %arg5: memref<4x8x32xf32, #tpu.memory_space<vmem>>, %arg6: memref<4x8x8xf32, #tpu.memory_space<vmem>>) attributes {dimension_semantics = [#tpu.dimension_semantics<parallel>, #tpu.dimension_semantics<arbitrary>], iteration_bounds = array<i64: 2, 1>, scalar_prefetch = 0 : i64, scratch_operands = 0 : i64, tpu.core_type = #tpu.core_type<tc>, window_params = [{transform_indices = @transform_0, window_bounds = array<i64: 4, 8, 32>}, {transform_indices = @transform_1, window_bounds = array<i64: 4, 8, 32>}, {transform_indices = @transform_2, window_bounds = array<i64: 4, 8, 32>}, {transform_indices = @transform_3, window_bounds = array<i64: 4, 8, 32>}, {transform_indices = @transform_4, window_bounds = array<i64: 4, 8, 8>}]} {
    %c0 = arith.constant 0 : index
    %c0_0 = arith.constant 0 : index
    %c0_1 = arith.constant 0 : index
    %0 = vector.load %arg2[%c0, %c0_0, %c0_1] : memref<4x8x32xf32, #tpu.memory_space<vmem>>, vector<4x8x32xf32>
    %cst = arith.constant 0.176776692 : f32
    %1 = vector.broadcast %cst : f32 to vector<4x8x32xf32>
    %2 = arith.mulf %0, %1 : vector<4x8x32xf32>
    %c0_2 = arith.constant 0 : index
    %c0_3 = arith.constant 0 : index
    %c0_4 = arith.constant 0 : index
    %3 = vector.load %arg3[%c0_2, %c0_3, %c0_4] : memref<4x8x32xf32, #tpu.memory_space<vmem>>, vector<4x8x32xf32>
    %c0_5 = arith.constant 0 : index
    %c0_6 = arith.constant 0 : index
    %c0_7 = arith.constant 0 : index
    %4 = vector.load %arg4[%c0_5, %c0_6, %c0_7] : memref<4x8x32xf32, #tpu.memory_space<vmem>>, vector<4x8x32xf32>
    %cst_8 = arith.constant dense<0.000000e+00> : vector<4x8x8xf32>
    %5 = tpu.matmul %2, %3, %cst_8 {dimension_numbers = #tpu.dot_dimension_numbers<[2], [2], [1], [1], [0, 0, 0, 1, 1, 1], [0], [0]>} : vector<4x8x32xf32>, vector<4x8x32xf32>, vector<4x8x8xf32> -> vector<4x8x8xf32>
    %cst_9 = arith.constant dense<0xFF800000> : vector<4x8xf32>
    %6 = vector.multi_reduction <maximumf>, %5, %cst_9 [2] : vector<4x8x8xf32> to vector<4x8xf32>
    %7 = vector.shape_cast %6 : vector<4x8xf32> to vector<4x8x1xf32>
    %8 = vector.broadcast %7 : vector<4x8x1xf32> to vector<4x8x8xf32>
    %9 = arith.subf %5, %8 : vector<4x8x8xf32>
    %10 = math.exp %9 : vector<4x8x8xf32>
    %cst_10 = arith.constant dense<0.000000e+00> : vector<4x8xf32>
    %11 = vector.multi_reduction <add>, %10, %cst_10 [2] : vector<4x8x8xf32> to vector<4x8xf32>
    %12 = vector.shape_cast %11 : vector<4x8xf32> to vector<4x8x1xf32>
    %13 = tpu.reciprocal %12 : vector<4x8x1xf32> -> vector<4x8x1xf32>
    %14 = vector.broadcast %13 : vector<4x8x1xf32> to vector<4x8x8xf32>
    %15 = arith.mulf %10, %14 : vector<4x8x8xf32>
    %c0_11 = arith.constant 0 : index
    %c0_12 = arith.constant 0 : index
    %c0_13 = arith.constant 0 : index
    %16 = vector.load %arg6[%c0_11, %c0_12, %c0_13] : memref<4x8x8xf32, #tpu.memory_space<vmem>>, vector<4x8x8xf32>
    tpu.vector_store %arg6[%c0_11, %c0_12, %c0_13], %15 {strides = array<i32>} : memref<4x8x8xf32, #tpu.memory_space<vmem>>, vector<4x8x8xf32>,
    %cst_14 = arith.constant dense<0.000000e+00> : vector<4x8x32xf32>
    %17 = tpu.matmul %15, %4, %cst_14 {dimension_numbers = #tpu.dot_dimension_numbers<[2], [1], [1], [2], [0, 0, 0, 1, 1, 2], [0], [0]>} : vector<4x8x8xf32>, vector<4x8x32xf32>, vector<4x8x32xf32> -> vector<4x8x32xf32>
    %c0_15 = arith.constant 0 : index
    %c0_16 = arith.constant 0 : index
    %c0_17 = arith.constant 0 : index
    %18 = vector.load %arg5[%c0_15, %c0_16, %c0_17] : memref<4x8x32xf32, #tpu.memory_space<vmem>>, vector<4x8x32xf32>
    tpu.vector_store %arg5[%c0_15, %c0_16, %c0_17], %17 {strides = array<i32>} : memref<4x8x32xf32, #tpu.memory_space<vmem>>, vector<4x8x32xf32>,
    return
  }
  func.func @transform_0(%arg0: i32, %arg1: i32) -> (i32, i32, i32) {
    %c0_i32 = arith.constant 0 : i32
    %c0_i32_0 = arith.constant 0 : i32
    return %arg0, %arg1, %c0_i32 : i32, i32, i32
  }
  func.func @transform_1(%arg0: i32, %arg1: i32) -> (i32, i32, i32) {
    %c0_i32 = arith.constant 0 : i32
    %c0_i32_0 = arith.constant 0 : i32
    %c0_i32_1 = arith.constant 0 : i32
    return %arg0, %c0_i32, %c0_i32_0 : i32, i32, i32
  }
  func.func @transform_2(%arg0: i32, %arg1: i32) -> (i32, i32, i32) {
    %c0_i32 = arith.constant 0 : i32
    %c0_i32_0 = arith.constant 0 : i32
    %c0_i32_1 = arith.constant 0 : i32
    return %arg0, %c0_i32, %c0_i32_0 : i32, i32, i32
  }
  func.func @transform_3(%arg0: i32, %arg1: i32) -> (i32, i32, i32) {
    %c0_i32 = arith.constant 0 : i32
    %c0_i32_0 = arith.constant 0 : i32
    return %arg0, %arg1, %c0_i32 : i32, i32, i32
  }
  func.func @transform_4(%arg0: i32, %arg1: i32) -> (i32, i32, i32) {
    %c0_i32 = arith.constant 0 : i32
    %c0_i32_0 = arith.constant 0 : i32
    return %arg0, %arg1, %c0_i32 : i32, i32, i32
  }
}

</mosaic_0001>

<bundles_post_ra>
// kernel: tpu_custom_call.1
= control target key start
LH: loop header
LB: loop body
LE: loop exit
PB: predicated region body
PF: predicated region fallthrough
CT: control target
= control target key end

     0   :  { %s2016_s0 = inlined_call_operand.hbm [shape: f32[8,8,32], index: 0, kind: input, shape index: {}]   ;;  %s2017_s1 = inlined_call_operand.hbm [shape: f32[8,8,32], index: 1, kind: input, shape index: {}]   ;;  %s2018_s2 = inlined_call_operand.hbm [shape: f32[8,8,32], index: 2, kind: input, shape index: {}]   ;;  %s2019_s3 = inlined_call_operand.hbm [shape: f32[8,8,32], index: 3, kind: output, shape index: {0}]   ;;  %s2020_s4 = inlined_call_operand.hbm [shape: f32[8,8,8], index: 4, kind: output, shape index: {1}]  }
   0x1   :  { %2032 = sst [smem:[#allocation19_spill]] %s2017_s1 }
   0x2   :  { %10 = vsyncpa [#allocation3], 0 }
   0x3   :  { %12 = vsyncpa [#allocation3 + $0x1], 0 }
   0x4   :  { %13 = vsyncpa [#allocation6], 0 }
   0x5   :  { %15 = vsyncpa [#allocation6 + $0x1], 0 }
   0x6   :  { %16 = vsyncpa [#allocation4], 0 }
   0x7   :  { %18 = vsyncpa [#allocation4 + $0x1], 0 }
   0x8   :  { %19 = vsyncpa [#allocation10], 0 }
   0x9   :  { %21 = vsyncpa [#allocation10 + $0x1], 0  ;;  %s1638_s15 = smov 0   ;;  %s1640_s16 = smov 0  }
   0xa   :  { %s1642_s17 = smov 0   ;;  %s1644_s18 = smov 0  }
   0xb   :  { %s1646_s19 = smov 0   ;;  %s1648_s20 = smov 0  }
   0xc LB: > { %2033 = sst [smem:[#allocation15_spill]] %s1596_s19  ;;  %s1669_s21 = sadd.s32 4294967295, %s1600_s20   ;;  %s1600_s20 = sphi %s1648_s20, %s27_s20   ;;  %s1596_s19 = sphi %s1646_s19, %s2058_s19   ;;  %s1592_s18 = sphi %s1644_s18, %s2057_s18   ;;  %s1588_s17 = sphi %s1642_s17, %s2061_s17   ;;  %s1584_s16 = sphi %s1640_s16, %s2060_s16   ;;  %s1580_s15 = sphi %s1638_s15, %s2059_s15  }
   0xd   : > { %2034 = sst [smem:[#allocation16_spill]] %s1600_s20  ;;  %s1194_s22 = sadd.s32 4294967294, %s1600_s20  }
   0xe   : > { %s39_s23 = sadd.s32 1, %s1596_s19  ;;  %s48_s24 = sadd.s32 1, %s1588_s17 }
   0xf   : > { %p41_p0 = scmp.ge.s32.totalorder %s39_s23, 2  ;;  %p55_p1 = scmp.ne.s32.totalorder %s1588_s17, %s1584_s16 }
  0x10   : > { %p56_p2 = scmp.eq.s32.totalorder %s1600_s20, 0  ;;  %p61_p3 = scmp.ne.s32.totalorder %s1584_s16, %s1580_s15 }
  0x11   : > { %s2063_s23 = smov (%p41_p0, %s39_s23), 0  ;;  %p62_p5 = scmp.eq.s32.totalorder %s1669_s21, 0 }
  0x12   : > { %2035 = sst [smem:[#allocation17_spill]] %s2063_s23  ;;  %p1681_p4 = por %p56_p2, %p55_p1 }
  0x13   : > { %s43_s26 = ssub.s32 %s1596_s19, %s2063_s23  ;;  %p139_p6 = scmp.eq.s32.totalorder %s1669_s21, 1 }
  0x14   : > { %p46_p7 = scmp.eq.s32.totalorder %s43_s26, 0  ;;  %p1689_p8 = por %p62_p5, %p61_p3 }
  0x15   : > { %p1693_p9 = por %p139_p6, %p55_p1  ;;  %p145_p10 = scmp.eq.s32.totalorder %s1194_s22, 1 }
  0x16   : > { %s2037_s27 = scalar_select %p1689_p8, 1, 0 }
  0x17   : > { %s2038_s28 = scalar_select %p1693_p9, 1, 0 }
  0x18   : > { %s1698_s29 = scalar_select %p46_p7, %s1588_s17, %s48_s24  }
  0x19   : > { %p1700_p11 = por %p145_p10, %p61_p3  ;;  %p1320_p13 = scmp.lt.s32.totalorder %s1600_s20, 2 }
  0x1a   : > { %2039 = sst [smem:[#allocation18_spill]] %s1698_s29  ;;  %s2021_s5 = sand.u32 1, %s1588_s17  }
  0x1b   : > { %s2040_s30 = scalar_select %p1700_p11, 1, 0 }
  0x1c   : > { %s1709_s6 = sshll.u32 %s2021_s5, 5  ;;  %s1712_s7 = sshll.u32 %s1596_s19, 9 }
  0x1d   : > { %p1716_p0 = pnand %p1320_p13, %p1681_p4  ;;  %s215_s9 = sand.u32 1, %s1600_s20  }
  0x1e   : > { %s2042_s1 = sld [smem:[#allocation19_spill]]  ;;  %s219_s13 = scalar_lea.vmem [#allocation5], %s1709_s6 }
  0x1f   : > { %s226_s14 = sshll.u32 %s219_s13, 4  ;;  %s1732_s22 = scalar_lea.sflag [#allocation6], %s215_s9  ;;  %s1729_s14 = int_to_ptr.vmem [resolvable:$true] %s226_s14 }
  0x20   : > { %p1738_p4 = pneg %p1716_p0 }
  0x24   : > { %s1725_s12 = scalar_lea.hbm %s2042_s1, %s1712_s7  ;;  %s1397_s11 = scalar_lea.hbm %s2042_s1, 1024 }
  0x25   : > { %s1392_s24 = scalar_lea.hbm %s1725_s12, 512  ;;  %p1398_p7 = scmp.lt.u32.totalorder %s1725_s12, %s2042_s1 }
  0x26   : > { %p1393_p3 = scmp.ne.s32.totalorder %s1725_s12, %s1392_s24  ;;  %p1399_p10 = scmp.lt.u32.totalorder %s1397_s11, %s1392_s24 }
  0x27   : > { %p1401_p12 = scmp.lt.u32.totalorder %s1392_s24, %s1725_s12 }
  0x28   : > { %p1395_p5 = pnand %p1738_p4, %p1393_p3  ;;  %p1400_p13 = por %p1399_p10, %p1398_p7 }
  0x2a   : > { %p1396_p6 = pneg %p1395_p5  ;;  %p1402_p1 = por %p1401_p12, %p1400_p13 }
  0x2c   : > { %p1403_p2 = pnand %p1402_p1, %p1396_p6 }
  0x2e   : > { %1406 = shalt.err (!%p1403_p2)
}
  0x2f   : > { %s1407_s9 = scalar_lea.vmem %s1729_s14, 512  ;;  %s1602_s26 = smov [#allocation5]  }
  0x30   : > { %p1408_p3 = scmp.ne.s32.totalorder %s1729_s14, %s1407_s9  ;;  %s1412_s10 = sshll.u32 %s1602_s26, 4  ;;  %s1413_s10 = int_to_ptr.vmem [resolvable:$false] %s1412_s10 }
  0x31   : > { %s1414_s5 = scalar_lea.vmem %s1413_s10, 1024  ;;  %p1415_p9 = scmp.lt.s32.totalorder %s1729_s14, %s1413_s10 }
  0x32   : > { %p1410_p5 = pnand %p1408_p3, %p1738_p4  ;;  %p1416_p8 = scmp.lt.s32.totalorder %s1414_s5, %s1407_s9 }
  0x34   : > { %p1411_p11 = pneg %p1410_p5  ;;  %p1417_p7 = por %p1416_p8, %p1415_p9 }
  0x36   : > { %p1418_p10 = pnand %p1417_p7, %p1411_p11 }
  0x38   : > { %1421 = shalt.err (!%p1418_p10)
}
  0x39   : > { %s2024_s24 = smov 128   ;;  %s2026_s11 = smov 8  }
  0x3a   : > { %1309 = dma.hbm_to_vmem [thread:$0]  (!%p1716_p0), %s1725_s12, 512, %s1729_s14, %s1732_s22, %s2024_s24, %s2024_s24, %s2026_s11  }
  0x3b   : > { %p2044_p8 = scmp.lt.s32.totalorder %s1600_s20, 3  ;;  %p2045_p9 = scmp.ge.s32.totalorder %s1600_s20, 1 }
  0x3c   : > { %s1777_s10 = scalar_lea.hbm %s2016_s0, %s1712_s7  ;;  %s197_s5 = scalar_lea.vmem [#allocation2], %s1709_s6 }
  0x3d   : > { %p1769_p11 = pnand %p2045_p9, %p2044_p8  ;;  %s205_s1 = sshll.u32 %s197_s5, 4  ;;  %s1780_s1 = int_to_ptr.vmem [resolvable:$true] %s205_s1 }
  0x3e   : > { %s1786_s24 = scalar_lea.hbm %s2018_s2, %s1712_s7  ;;  %s2047_s11 = sand.u32 1, %s1588_s17  }
  0x3f   : > { %s2046_s13 = scalar_select %p1769_p11, 1, 0 }
  0x40   : > { %s1790_s23 = scalar_lea.sflag [#allocation3], %s2047_s11  ;;  %s1422_s19 = scalar_lea.hbm %s1777_s10, 512 }
  0x41   : > { %p1423_p12 = scmp.ne.s32.totalorder %s1777_s10, %s1422_s19  ;;  %s1427_s29 = scalar_lea.hbm %s2016_s0, 1024 }
  0x42   : > { %p1428_p6 = scmp.lt.u32.totalorder %s1777_s10, %s2016_s0  ;;  %p1429_p13 = scmp.lt.u32.totalorder %s1427_s29, %s1422_s19 }
  0x43   : > { %p1425_p1 = pnand %p1423_p12, %p1738_p4  ;;  %p1431_p5 = scmp.lt.u32.totalorder %s1422_s19, %s1777_s10 }
  0x44   : > { %p1430_p3 = por %p1429_p13, %p1428_p6 }
  0x45   : > { %p1426_p2 = pneg %p1425_p1 }
  0x46   : > { %p1432_p7 = por %p1431_p5, %p1430_p3 }
  0x48   : > { %p1433_p10 = pnand %p1432_p7, %p1426_p2 }
  0x4a   : > { %1436 = shalt.err (!%p1433_p10)
}
  0x4b   : > { %s1437_s7 = scalar_lea.vmem %s1780_s1, 512  ;;  %s1605_s11 = smov [#allocation2]  }
  0x4c   : > { %p1438_p8 = scmp.ne.s32.totalorder %s1780_s1, %s1437_s7  ;;  %s1442_s12 = sshll.u32 %s1605_s11, 4  ;;  %s1443_s12 = int_to_ptr.vmem [resolvable:$false] %s1442_s12 }
  0x4d   : > { %s1444_s20 = scalar_lea.vmem %s1443_s12, 1024  ;;  %p1445_p1 = scmp.lt.s32.totalorder %s1780_s1, %s1443_s12 }
  0x4e   : > { %p1440_p9 = pnand %p1438_p8, %p1738_p4  ;;  %p1446_p11 = scmp.lt.s32.totalorder %s1444_s20, %s1437_s7 }
  0x50   : > { %p1441_p12 = pneg %p1440_p9  ;;  %p1447_p6 = por %p1446_p11, %p1445_p1 }
  0x52   : > { %p1448_p13 = pnand %p1447_p6, %p1441_p12 }
  0x54   : > { %1451 = shalt.err (!%p1448_p13)
}
  0x55   : > { %s2048_s19 = smov 8   ;;  %s2049_s29 = smov 128  }
  0x56   : > { %1306 = dma.hbm_to_vmem [thread:$0]  (!%p1716_p0), %s1777_s10, 512, %s1780_s1, %s1790_s23, %s2049_s29, %s2049_s29, %s2048_s19  }
  0x57   : > { %s240_s14 = scalar_lea.vmem [#allocation7], %s1709_s6  ;;  %s1452_s26 = scalar_lea.hbm %s1786_s24, 512 }
  0x58   : > { %s247_s9 = sshll.u32 %s240_s14, 4  ;;  %p1453_p11 = scmp.ne.s32.totalorder %s1786_s24, %s1452_s26  ;;  %s1818_s9 = int_to_ptr.vmem [resolvable:$true] %s247_s9 }
  0x59   : > { %s1457_s11 = scalar_lea.hbm %s2018_s2, 1024  ;;  %p1458_p5 = scmp.lt.u32.totalorder %s1786_s24, %s2018_s2 }
  0x5a   : > { %p1455_p2 = pnand %p1453_p11, %p1738_p4  ;;  %p1459_p7 = scmp.lt.u32.totalorder %s1457_s11, %s1452_s26 }
  0x5b   : > { %p1461_p8 = scmp.lt.u32.totalorder %s1452_s26, %s1786_s24 }
  0x5c   : > { %p1456_p3 = pneg %p1455_p2  ;;  %p1460_p10 = por %p1459_p7, %p1458_p5 }
  0x5e   : > { %p1462_p9 = por %p1461_p8, %p1460_p10 }
  0x60   : > { %p1463_p12 = pnand %p1462_p9, %p1456_p3 }
  0x62   : > { %1466 = shalt.err (!%p1463_p12)
}
  0x63   : > { %s1467_s1 = scalar_lea.vmem %s1818_s9, 512  ;;  %s1606_s23 = smov [#allocation7]  }
  0x64   : > { %p1468_p1 = scmp.ne.s32.totalorder %s1818_s9, %s1467_s1  ;;  %s1472_s6 = sshll.u32 %s1606_s23, 4  ;;  %s1473_s6 = int_to_ptr.vmem [resolvable:$false] %s1472_s6 }
  0x65   : > { %s1474_s10 = scalar_lea.vmem %s1473_s6, 1024  ;;  %p1475_p11 = scmp.lt.s32.totalorder %s1818_s9, %s1473_s6 }
  0x66   : > { %p1470_p6 = pnand %p1468_p1, %p1738_p4  ;;  %p1476_p2 = scmp.lt.s32.totalorder %s1474_s10, %s1467_s1 }
  0x68   : > { %p1471_p13 = pneg %p1470_p6  ;;  %p1477_p5 = por %p1476_p2, %p1475_p11 }
  0x6a   : > { %p1478_p7 = pnand %p1477_p5, %p1471_p13 }
  0x6c   : > { %1481 = shalt.err (!%p1478_p7)
}
  0x6d   : > { %1312 = dma.hbm_to_vmem [thread:$0]  (!%p1716_p0), %s1786_s24, 512, %s1818_s9, %s1732_s22, %s2049_s29, %s2049_s29, %s2048_s19  }
  0x6e   : > { %p2050_p4 = scmp.ne.s32.totalorder %s2046_s13, 0 }
  0x6f   : > { %s1848_s25 = sand.u32 (!%p2050_p4), 1, %s1584_s16   ;;  %p2051_p3 = scmp.ne.s32.totalorder (!%p2050_p4), %s2037_s27, 0 }
  0x70   : > { %259 = sbr.rel (%p2050_p4) target bundleno = 889 (0x379), region = 32  ;;  %s1851_s14 = sshll.u32 (!%p2050_p4), %s1848_s25, 5 }
  0x71   : > { %s262_s8 = scalar_lea.sflag (!%p2050_p4), [#allocation3], %s1848_s25  ;;  %s265_s26 = scalar_lea.vmem (!%p2050_p4), [#allocation2], %s1851_s14 }
  0x77   : > { %1563 = dma.done.wait (%p2051_p3), %s262_s8, 512  }
  0x78   : > { %1565 = vsyncadd (%p2051_p3), %s262_s8, 4294966784  ;;  %s270_s22 = sand.u32 1, %s1669_s21   ;;  %s274_s13 = scalar_lea.vmem [#allocation5], %s1851_s14 }
  0x79   : > { %s271_s24 = scalar_lea.sflag [#allocation6], %s270_s22 }
  0x7a   : > { %1567 = dma.done.wait (%p2051_p3), %s271_s24, 1024  }
  0x7b   : > { %1569 = vsyncadd (%p2051_p3), %s271_s24, 4294966272  ;;  %v1607_v0 = vmov 0.0   ;;  %vm1608_vm0 = vmmov 0   ;;  %vm344_vm1 = vcmask 261120   ;;  %v336_v1 = vld [vmem:[%s274_s13] sm:$0xff]  ;;  %v337_v3 = vld [vmem:[%s274_s13 + $0x8] sm:$0xff] }
  0x7c   : > { %1253 = vmatprep.subr.mxu0 %v1607_v0  ;;  %1255 = vmatprep.mubr.msk.f32.mxu0 %vm1608_vm0, %v1607_v0  ;;  %v328_v2 = vld [vmem:[%s265_s26] sm:$0xff]  ;;  %v329_v5 = vld [vmem:[%s265_s26 + $0x8] sm:$0xff]  ;;  %v330_v6 = vld [vmem:[%s265_s26 + $0x10] sm:$0xff]  ;;  %vm649_vm2 = vcmask 64512   ;;  %s283_s21 = scalar_lea.vmem [#allocation7], %s1851_s14  ;;  %s322_s27 = scalar_lea.vmem [#allocation9], %s1851_s14 }
  0x7d   : > { %1258 = vmatprep.subr.mxu1 %v1607_v0  ;;  %1260 = vmatprep.mubr.msk.f32.mxu1 %vm1608_vm0, %v1607_v0  ;;  %v332_v4 = vmul.f32 0.17677669, %v328_v2  ;;  %v338_v7 = vld [vmem:[%s274_s13 + $0x10] sm:$0xff]  ;;  %v333_v8 = vmul.f32 0.17677669, %v329_v5  ;;  %v331_v9 = vld [vmem:[%s265_s26 + $0x18] sm:$0xff] }
  0x7e   : > { %1254 = vmatpush3.xpose.msk.msra.mxu0 %vm344_vm1, %v336_v1  ;;  %1259 = vmatpush3.xpose.msk.msra.mxu1 %vm344_vm1, %v337_v3  ;;  %v339_v10 = vld [vmem:[%s274_s13 + $0x18] sm:$0xff]  ;;  %v334_v11 = vmul.f32 0.17677669, %v330_v6  ;;  %v335_v12 = vmul.f32 0.17677669, %v331_v9  ;;  %v340_v45 = vld [vmem:[%s283_s21] sm:$0xff] }
  0x7f   : > { %1263 = vmatprep.subr.mxu0 %v1607_v0  ;;  %1268 = vmatprep.subr.mxu1 %v1607_v0  ;;  %v341_v46 = vld [vmem:[%s283_s21 + $0x8] sm:$0xff]  ;;  %v342_v53 = vld [vmem:[%s283_s21 + $0x10] sm:$0xff]  ;;  %v343_v57 = vld [vmem:[%s283_s21 + $0x18] sm:$0xff]  ;;  %s1235_s19 = sshll.u32 %s1592_s18, 9  ;;  %s1031_s7 = sshll.u32 %s322_s27, 4  ;;  %s1923_s7 = int_to_ptr.vmem [resolvable:$true] %s1031_s7 }
  0x80   : > { %s1921_s5 = scalar_lea.hbm %s2020_s4, %s1235_s19  ;;  %s1000_s11 = scalar_lea.sflag [#allocation10], %s1848_s25 }
  0x81   : > { %1256 = vmatmul.mubr.msk.f32.vlgmr.msra.gmra.mrb[0].mxu0 %vm344_vm1, %v332_v4  ;;  %1261 = vmatmul.mubr.msk.f32.vlgmr.msra.gmra.mrb[0].mxu1 %vm344_vm1, %v333_v8  ;;  %s1482_s12 = scalar_lea.vmem %s1923_s7, 512  ;;  %p2052_p10 = scmp.ne.s32.totalorder %s2038_s28, 0 }
  0x82   : > { %1264 = vmatpush3.xpose.msk.msra.mxu0 %vm344_vm1, %v338_v7  ;;  %1265 = vmatprep.mubr.msk.f32.mxu0 %vm1608_vm0, %v1607_v0  ;;  %p1483_p0 = scmp.ne.s32.totalorder %s1923_s7, %s1482_s12  ;;  %s1609_s20 = smov [#allocation9]  }
  0x83   : > { %1269 = vmatpush3.xpose.msk.msra.mxu1 %vm344_vm1, %v339_v10  ;;  %1270 = vmatprep.mubr.msk.f32.mxu1 %vm1608_vm0, %v1607_v0  ;;  %s1486_s1 = sshll.u32 %s1609_s20, 4  ;;  %s1487_s1 = int_to_ptr.vmem [resolvable:$false] %s1486_s1 }
  0x84   : > { %1273 = vmatprep.subr.mxu0 %v1607_v0  ;;  %1278 = vmatprep.subr.mxu1 %v1607_v0  ;;  %p1484_p8 = pnand %p1483_p0, %p2052_p10  ;;  %s1488_s23 = scalar_lea.vmem %s1487_s1, 1024 }
  0x85   : > { %1266 = vmatmul.mubr.msk.f32.vlgmr.msra.gmra.mrb[2].mxu0 %vm344_vm1, %v334_v11  ;;  %p1489_p12 = scmp.lt.s32.totalorder %s1923_s7, %s1487_s1  ;;  %p1490_p1 = scmp.lt.s32.totalorder %s1488_s23, %s1482_s12 }
  0x86   : > { %1271 = vmatmul.mubr.msk.f32.vlgmr.msra.gmra.mrb[2].mxu1 %vm344_vm1, %v335_v12  ;;  %1275 = vmatprep.mubr.msk.f32.mxu0 %vm1608_vm0, %v1607_v0  ;;  %p1485_p9 = pneg %p1484_p8 }
  0x87   : > { %1280 = vmatprep.mubr.msk.f32.mxu1 %vm1608_vm0, %v1607_v0  ;;  %1274 = vmatpush3.msra.mxu0 %v340_v45  ;;  %p1491_p6 = por %p1490_p1, %p1489_p12 }
  0x88   : > { %1283 = vmatprep.subr.mxu0 %v1607_v0  ;;  %1279 = vmatpush3.msra.mxu1 %v341_v46 }
  0x89   : > { %1288 = vmatprep.subr.mxu1 %v1607_v0  ;;  %p1492_p13 = pnand %p1491_p6, %p1485_p9 }
 0x154   : > { %v417_v13 = vpop.f32.mrb[0].mxu0  ;;  %v493_v14 = vpop.f32.mrb[0].mxu1 }
 0x155   : > { %v1257_v15 = vpop.f32.mrb[1].mxu0  ;;  %v650_v16 = vsel %vm649_vm2, %v417_v13, -inf  ;;  %v1262_v17 = vpop.f32.mrb[1].mxu1  ;;  %v653_v18 = vsel %vm649_vm2, %v493_v14, -inf }
 0x156   : > { %651 = vmax.xlane.f32.xlu0 %v650_v16 }
 0x158   : > { %v569_v19 = vpop.f32.mrb[2].mxu0 }
 0x159   : > { %v1267_v20 = vpop.f32.mrb[3].mxu0  ;;  %v656_v21 = vsel %vm649_vm2, %v569_v19, -inf  ;;  %v645_v22 = vpop.f32.mrb[2].mxu1 }
 0x15a   : > { %654 = vmax.xlane.f32.xlu0 %v653_v18  ;;  %657 = vmax.xlane.f32.xlu1 %v656_v21  ;;  %v1272_v23 = vpop.f32.mrb[3].mxu1  ;;  %v659_v24 = vsel %vm649_vm2, %v645_v22, -inf }
 0x15e   : > { %660 = vmax.xlane.f32.xlu1 %v659_v24 }
 0x1e3   : > { %v652_v25 = vpop.xlane.xlu0 %651 }
 0x1e4   : > { %v662_v26 = vsub.f32 %v417_v13, %v652_v25 }
 0x1e6   : > { %v666_v27 = vmul.f32 1.442695, %v662_v26 }
 0x1e7   : > { %v655_v28 = vpop.xlane.xlu0 %654  ;;  %v658_v29 = vpop.xlane.xlu1 %657 }
 0x1e8   : > { %1376 = vpow2.f32 %v666_v27  ;;  %v663_v30 = vsub.f32 %v493_v14, %v655_v28  ;;  %v664_v31 = vsub.f32 %v569_v19, %v658_v29 }
 0x1ea   : > { %v668_v32 = vmul.f32 1.442695, %v663_v30  ;;  %v670_v33 = vmul.f32 1.442695, %v664_v31 }
 0x1eb   : > { %v661_v34 = vpop.xlane.xlu1 %660 }
 0x1ec   : > { %1378 = vpow2.f32 %v668_v32  ;;  %v665_v35 = vsub.f32 %v645_v22, %v661_v34 }
 0x1ed   : > { %1380 = vpow2.f32 %v670_v33 }
 0x1ee   : > { %v672_v36 = vmul.f32 1.442695, %v665_v35 }
 0x1f0   : > { %1382 = vpow2.f32 %v672_v36 }
 0x1f2   : > { %v1377_v37 = vpop.eup %1376 }
 0x1f3   : > { %v674_v38 = vsel %vm649_vm2, %v1377_v37, 0.0 }
 0x1f4   : > { %675 = vadd.xlane.f32.xlu0 %v674_v38 }
 0x1f6   : > { %v1379_v39 = vpop.eup %1378 }
 0x1f7   : > { %v1381_v40 = vpop.eup %1380  ;;  %v677_v41 = vsel %vm649_vm2, %v1379_v39, 0.0 }
 0x1f8   : > { %678 = vadd.xlane.f32.xlu1 %v677_v41  ;;  %v680_v42 = vsel %vm649_vm2, %v1381_v40, 0.0 }
 0x1f9   : > { %681 = vadd.xlane.f32.xlu0 %v680_v42 }
 0x1fa   : > { %v1383_v43 = vpop.eup %1382 }
 0x1fb   : > { %v683_v44 = vsel %vm649_vm2, %v1383_v43, 0.0 }
 0x1fc   : > { %684 = vadd.xlane.f32.xlu1 %v683_v44 }
 0x281   : > { %v676_v47 = vpop.xlane.xlu0 %675 }
 0x282   : > { %1384 = vrcp.f32 %v676_v47 }
 0x285   : > { %v679_v48 = vpop.xlane.xlu1 %678 }
 0x286   : > { %v682_v49 = vpop.xlane.xlu0 %681  ;;  %1386 = vrcp.f32 %v679_v48 }
 0x287   : > { %1388 = vrcp.f32 %v682_v49 }
 0x289   : > { %v685_v50 = vpop.xlane.xlu1 %684 }
 0x28a   : > { %1390 = vrcp.f32 %v685_v50 }
 0x28c   : > { %v1385_v51 = vpop.eup %1384 }
 0x28d   : > { %v690_v52 = vmul.f32 %v1385_v51, %v1377_v37 }
 0x28f   : > { %694 = vst.msk [vmem:[%s322_s27] sm:$0xff] %vm649_vm2, %v690_v52  ;;  %1276 = vmatmul.mubr.msk.f32.vlgmr.msra.gmra.mrb[4].mxu0 %vm649_vm2, %v690_v52 }
 0x290   : > { %v1387_v54 = vpop.eup %1386  ;;  %1284 = vmatpush3.msra.mxu0 %v342_v53  ;;  %1285 = vmatprep.mubr.msk.f32.mxu0 %vm1608_vm0, %v1607_v0 }
 0x291   : > { %v1389_v55 = vpop.eup %1388  ;;  %v691_v56 = vmul.f32 %v1387_v54, %v1379_v39 }
 0x292   : > { %v692_v58 = vmul.f32 %v1389_v55, %v1381_v40 }
 0x293   : > { %695 = vst.msk [vmem:[%s322_s27 + $0x8] sm:$0xff] %vm649_vm2, %v691_v56  ;;  %1281 = vmatmul.mubr.msk.f32.vlgmr.msra.gmra.mrb[4].mxu1 %vm649_vm2, %v691_v56 }
 0x294   : > { %v1391_v59 = vpop.eup %1390  ;;  %696 = vst.msk [vmem:[%s322_s27 + $0x10] sm:$0xff] %vm649_vm2, %v692_v58  ;;  %1286 = vmatmul.mubr.msk.f32.vlgmr.msra.gmra.mrb[6].mxu0 %vm649_vm2, %v692_v58  ;;  %1289 = vmatpush3.msra.mxu1 %v343_v57 }
 0x295   : > { %v693_v60 = vmul.f32 %v1391_v59, %v1383_v43  ;;  %1290 = vmatprep.mubr.msk.f32.mxu1 %vm1608_vm0, %v1607_v0 }
 0x297   : > { %697 = vst.msk [vmem:[%s322_s27 + $0x18] sm:$0xff] %vm649_vm2, %v693_v60  ;;  %1291 = vmatmul.mubr.msk.f32.vlgmr.msra.gmra.mrb[6].mxu1 %vm649_vm2, %v693_v60 }
 0x298   : > { %1495 = shalt.err (!%p1492_p13)
}
 0x299   : > { %s1496_s6 = scalar_lea.hbm %s1921_s5, 512  ;;  %s1500_s26 = scalar_lea.hbm %s2020_s4, 1024 }
 0x29a   : > { %p1497_p11 = scmp.ne.s32.totalorder %s1921_s5, %s1496_s6  ;;  %p1501_p7 = scmp.lt.u32.totalorder %s1921_s5, %s2020_s4 }
 0x29b   : > { %p1502_p4 = scmp.lt.u32.totalorder %s1500_s26, %s1496_s6  ;;  %p1504_p0 = scmp.lt.u32.totalorder %s1496_s6, %s1921_s5 }
 0x29c   : > { %p1498_p2 = pnand %p1497_p11, %p2052_p10 }
 0x29d   : > { %p1503_p3 = por %p1502_p4, %p1501_p7 }
 0x29e   : > { %p1499_p5 = pneg %p1498_p2 }
 0x29f   : > { %p1505_p8 = por %p1504_p0, %p1503_p3 }
 0x2a1   : > { %p1506_p9 = pnand %p1505_p8, %p1499_p5 }
 0x2a3   : > { %1509 = shalt.err (!%p1506_p9)
}
 0x2a4   : > { %s1610_s13 = smov 128   ;;  %s1611_s21 = smov 8  }
 0x2a5   : > { %1300 = dma.vmem_to_hbm [thread:$0]  (%p2052_p10), %s1923_s7, 512, %s1921_s5, %s1000_s11, %s1610_s13, %s1610_s13, %s1611_s21  }
 0x2a6   : > { %s315_s27 = scalar_lea.vmem [#allocation8], %s1851_s14  ;;  %s1963_s5 = scalar_lea.hbm %s2019_s3, %s1235_s19 }
 0x2a7   : > { %s1014_s29 = sshll.u32 %s315_s27, 4  ;;  %s995_s7 = scalar_lea.sflag [#allocation4], %s1848_s25  ;;  %s1955_s29 = int_to_ptr.vmem [resolvable:$true] %s1014_s29 }
 0x2a8   : > { %s1510_s11 = scalar_lea.vmem %s1955_s29, 512  ;;  %s1612_s12 = smov [#allocation8]  }
 0x2a9   : > { %p1511_p12 = scmp.ne.s32.totalorder %s1955_s29, %s1510_s11  ;;  %s1514_s20 = sshll.u32 %s1612_s12, 4  ;;  %s1515_s20 = int_to_ptr.vmem [resolvable:$false] %s1514_s20 }
 0x2aa   : > { %s1516_s1 = scalar_lea.vmem %s1515_s20, 1024  ;;  %p1517_p13 = scmp.lt.s32.totalorder %s1955_s29, %s1515_s20 }
 0x2ab   : > { %p1512_p1 = pnand %p1511_p12, %p2052_p10  ;;  %p1518_p11 = scmp.lt.s32.totalorder %s1516_s1, %s1510_s11 }
 0x2ad   : > { %p1513_p6 = pneg %p1512_p1  ;;  %p1519_p2 = por %p1518_p11, %p1517_p13 }
 0x2af   : > { %p1520_p5 = pnand %p1519_p2, %p1513_p6 }
 0x362   : > { %v767_v61 = vpop.f32.mrb[4].mxu0 }
 0x363   : > { %990 = vst.msk [vmem:[%s315_s27] sm:$0xff] %vm344_vm1, %v767_v61  ;;  %v1277_v62 = vpop.f32.mrb[5].mxu0 }
 0x366   : > { %v840_v63 = vpop.f32.mrb[4].mxu1 }
 0x367   : > { %991 = vst.msk [vmem:[%s315_s27 + $0x8] sm:$0xff] %vm344_vm1, %v840_v63  ;;  %v913_v0 = vpop.f32.mrb[6].mxu0  ;;  %v1282_v1 = vpop.f32.mrb[5].mxu1 }
 0x368   : > { %992 = vst.msk [vmem:[%s315_s27 + $0x10] sm:$0xff] %vm344_vm1, %v913_v0  ;;  %v1287_v2 = vpop.f32.mrb[7].mxu0 }
 0x36a   : > { %v986_v3 = vpop.f32.mrb[6].mxu1 }
 0x36b   : > { %993 = vst.msk [vmem:[%s315_s27 + $0x18] sm:$0xff] %vm344_vm1, %v986_v3  ;;  %v1292_v4 = vpop.f32.mrb[7].mxu1 }
 0x36c   : > { %1523 = shalt.err (!%p1520_p5)
}
 0x36d   : > { %s1524_s18 = scalar_lea.hbm %s1963_s5, 512  ;;  %s1528_s6 = scalar_lea.hbm %s2019_s3, 1024 }
 0x36e   : > { %p1525_p7 = scmp.ne.s32.totalorder %s1963_s5, %s1524_s18  ;;  %p1529_p0 = scmp.lt.u32.totalorder %s1963_s5, %s2019_s3 }
 0x36f   : > { %p1530_p8 = scmp.lt.u32.totalorder %s1528_s6, %s1524_s18  ;;  %p1532_p12 = scmp.lt.u32.totalorder %s1524_s18, %s1963_s5 }
 0x370   : > { %p1526_p4 = pnand %p1525_p7, %p2052_p10 }
 0x371   : > { %p1531_p9 = por %p1530_p8, %p1529_p0 }
 0x372   : > { %p1527_p3 = pneg %p1526_p4 }
 0x373   : > { %p1533_p1 = por %p1532_p12, %p1531_p9 }
 0x375   : > { %p1534_p6 = pnand %p1533_p1, %p1527_p3 }
 0x377   : > { %1537 = shalt.err (!%p1534_p6)
}
 0x378   : > { %1299 = dma.vmem_to_hbm [thread:$0]  (%p2052_p10), %s1955_s29, 512, %s1963_s5, %s995_s7, %s1610_s13, %s1610_s13, %s1611_s21  }
 0x379 PF: > { %s2053_s26 = sld [smem:[#allocation16_spill]]  ;;  %s1046_s22 = sand.u32 1, %s1580_s15  }
 0x37a   : > { %p2054_p13 = scmp.ne.s32.totalorder %s2040_s30, 0  ;;  %s1047_s24 = scalar_lea.sflag [#allocation4], %s1046_s22 }
 0x37f   : > { %p2055_p11 = scmp.ge.s32.totalorder %s2053_s26, 2 }
 0x381   : > { %p1314_p2 = pnand %p2055_p11, %p2054_p13 }
 0x383   : > { %1571 = dma.done.wait (!%p1314_p2), %s1047_s24, 512  }
 0x384   : > { %1573 = vsyncadd (!%p1314_p2), %s1047_s24, 4294966784  ;;  %s1056_s28 = scalar_lea.sflag [#allocation10], %s1046_s22 }
 0x385   : > { %1575 = dma.done.wait (!%p1314_p2), %s1056_s28, 512  }
 0x386   : > { %1577 = vsyncadd (!%p1314_p2), %s1056_s28, 4294966784  ;;  %s27_s20 = sadd.s32 1, %s2053_s26   ;;  %s2056_s25 = sld [smem:[#allocation18_spill]] }
 0x387   : > { %p24_p5 = scmp.ge.s32.totalorder %s27_s20, 4   ;;  %s2057_s18 = sld [smem:[#allocation15_spill]] }
 0x388   : > { %s2058_s19 = sld [smem:[#allocation17_spill]]  ;;  %s2059_s15 = smov %s1584_s16 }
 0x389   : > { %s2060_s16 = smov %s1588_s17  ;;  %26 = sbr.rel (!%p24_p5) target bundleno = 12 (0xc), region = 118 }
 0x38c   : > { %s2061_s17 = smov %s2056_s25 }
 0x390   :  { %1061 = vsyncpa [#allocation3], 1 }
 0x391   :  { %1063 = vsyncpa [#allocation3 + $0x1], 1 }
 0x392   :  { %1064 = vsyncpa [#allocation6], 1 }
 0x393   :  { %1066 = vsyncpa [#allocation6 + $0x1], 1 }
 0x394   :  { %1067 = vsyncpa [#allocation4], 1 }
 0x395   :  { %1069 = vsyncpa [#allocation4 + $0x1], 1 }
 0x396   :  { %1070 = vsyncpa [#allocation10], 1 }
 0x397   :  { %1072 = vsyncpa [#allocation10 + $0x1], 1 }

</bundles_post_ra>
